<compile_context>
chip_gen: v7x
topology: tpu7x:2x2x1
jax: 0.10.0
libtpu: 0.0.40
codegen_flags: <defaults>
</compile_context>

<pallas_src>
from functools import partial

import jax
import jax.numpy as jnp
from jax.experimental import pallas as pl
from jax.experimental.pallas import tpu as pltpu


def _block_kernel(*refs, H, W, cin, cout, groups, eps, film):
    if film:
        (x_ref, w_ref, b_ref, g_ref, be_ref, mask_ref, p_ref,
         sc_ref, sh_ref, out_ref) = refs
    else:
        (x_ref, w_ref, b_ref, g_ref, be_ref, mask_ref, p_ref, out_ref) = refs

    Wp = W + 2
    L = H * Wp                                    # compute width (incl. 2 pad cols/row)
    inv_n = 1.0 / float(H * W * (cout // groups))

    xf = x_ref[0]                                 # (cin, Lx) flat zero-padded image

    # --- 3x3 conv: 9 lane-offset slices, each one MXU matmul, f32 accumulate.
    # Bias is folded into the tap-0 expression (no zero-fill, no extra add).
    acc = jnp.dot(w_ref[0], xf[:, 0:L],
                  preferred_element_type=jnp.float32) + b_ref[...]
    for k in range(1, 9):
        dy, dx = divmod(k, 3)
        off = dy * Wp + dx
        acc = acc + jnp.dot(w_ref[k], xf[:, off:off + L],
                            preferred_element_type=jnp.float32)

    # --- GroupNorm: one pass over acc for masked sum(x) / sum(x^2);
    # group reduce + broadcast-back via two independent group-projection matmuls.
    am = acc * mask_ref[...]                      # pad columns zeroed for the stats
    s1 = jnp.sum(am, axis=1, keepdims=True)       # (cout, 1)
    s2 = jnp.sum(am * acc, axis=1, keepdims=True) # (cout, 1)
    mean = jnp.dot(p_ref[...], s1, preferred_element_type=jnp.float32) * inv_n
    ex2 = jnp.dot(p_ref[...], s2, preferred_element_type=jnp.float32) * inv_n
    var = ex2 - mean * mean
    y = (acc - mean) * jax.lax.rsqrt(var + eps)
    y = y * g_ref[...] + be_ref[...]

    # --- optional FiLM: x * (scale + 1) + shift (statically specialized).
    if film:
        y = y * (sc_ref[0] + 1.0) + sh_ref[0]

    # --- SiLU: x * sigmoid(x); exp and reciprocal both go to the EUP slot.
    y = y * pl.reciprocal(1.0 + jnp.exp(-y), approx=True)

    out_ref[0] = y                                # (cout, L) lane-dense store


def block_forward(x, weight, bias, gamma, beta, scale_shift=None, *,
                  groups=8, eps=1e-5):
    """SiLU(GroupNorm(Conv2d_3x3(x)) [* (scale+1) + shift]) — PyTorch `Block`.

    x:      (B, C_in, H, W) NCHW (PyTorch layout)
    weight: (C_out, C_in, 3, 3);  bias/gamma/beta: (C_out,)
    scale_shift: optional tuple of (B, C_out, 1, 1) tensors
    returns (B, C_out, H, W)
    """
    B, C_in, H, W = x.shape
    C_out = weight.shape[0]
    assert C_out % groups == 0, "dim_out must be divisible by groups"
    Hp, Wp = H + 2, W + 2
    L = H * Wp                                    # in-kernel compute width
    # Flat padded-image length: max tap offset is 2*Wp+2, slice length is L.
    Lx = ((L + 2 * Wp + 2 + 127) // 128) * 128    # lane-aligned, >= Hp*Wp
    film = scale_shift is not None

    # ---- host-side layout plumbing only (pad / transpose / reshape) ----------
    x_pad = jnp.pad(x.astype(jnp.float32), ((0, 0), (0, 0), (1, 1), (1, 1)))
    x_flat = x_pad.reshape(B, C_in, Hp * Wp)
    x_flat = jnp.pad(x_flat, ((0, 0), (0, 0), (0, Lx - Hp * Wp)))   # zero tail

    # Conv weights, taps-major, each tap (C_out, C_in) ready for W @ x.
    w_taps = jnp.transpose(weight.astype(jnp.float32),
                           (2, 3, 0, 1)).reshape(9, C_out, C_in)
    b_col = bias.astype(jnp.float32).reshape(C_out, 1)
    g_col = gamma.astype(jnp.float32).reshape(C_out, 1)
    be_col = beta.astype(jnp.float32).reshape(C_out, 1)

    # Validity mask over the L compute columns (0 on the 2 pad cols of each row).
    col = jnp.arange(L, dtype=jnp.int32) % Wp
    mask = (col < W).astype(jnp.float32).reshape(1, L)

    # Group projection: P[i, j] = 1 iff channels i and j share a GroupNorm group.
    gid = jnp.arange(C_out, dtype=jnp.int32) // (C_out // groups)
    proj = (gid[:, None] == gid[None, :]).astype(jnp.float32)      # (C_out, C_out)

    operands = [x_flat, w_taps, b_col, g_col, be_col, mask, proj]
    in_specs = [
        pl.BlockSpec((1, C_in, Lx), lambda b: (b, 0, 0)),
        pl.BlockSpec((9, C_out, C_in), lambda b: (0, 0, 0)),
        pl.BlockSpec((C_out, 1), lambda b: (0, 0)),
        pl.BlockSpec((C_out, 1), lambda b: (0, 0)),
        pl.BlockSpec((C_out, 1), lambda b: (0, 0)),
        pl.BlockSpec((1, L), lambda b: (0, 0)),
        pl.BlockSpec((C_out, C_out), lambda b: (0, 0)),
    ]
    if film:
        s, t = scale_shift
        operands += [jnp.reshape(s.astype(jnp.float32), (B, C_out, 1)),
                     jnp.reshape(t.astype(jnp.float32), (B, C_out, 1))]
        in_specs += [pl.BlockSpec((1, C_out, 1), lambda b: (b, 0, 0)),
                     pl.BlockSpec((1, C_out, 1), lambda b: (b, 0, 0))]

    # VMEM budget: double-buffered in/out blocks + resident params + headroom,
    # kept well under v7x's 64 MiB physical VMEM (fits v5e/v6e trivially).
    x_bytes = C_in * Lx * 4
    o_bytes = C_out * L * 4
    p_bytes = (9 * C_out * C_in + 3 * C_out + L + C_out * C_out
               + (2 * C_out if film else 0)) * 4
    vmem_limit = int(min(48 * 2 ** 20,
                         max(8 * 2 ** 20,
                             4 * (x_bytes + o_bytes) + 2 * p_bytes + (2 << 20))))

    out = pl.pallas_call(
        partial(_block_kernel, H=H, W=W, cin=C_in, cout=C_out,
                groups=groups, eps=eps, film=film),
        out_shape=jax.ShapeDtypeStruct((B, C_out, L), jnp.float32),
        grid_spec=pltpu.PrefetchScalarGridSpec(
            num_scalar_prefetch=0,
            grid=(B,),
            in_specs=in_specs,
            out_specs=pl.BlockSpec((1, C_out, L), lambda b: (b, 0, 0)),
        ),
        compiler_params=pltpu.CompilerParams(
            dimension_semantics=("parallel",),
            vmem_limit_bytes=vmem_limit),
    )(*operands)

    # Drop the 2 horizontal-pad columns per row (single XLA slice) -> NCHW.
    return out.reshape(B, C_out, H, Wp)[:, :, :, :W]


def _reference(x, weight, bias, gamma, beta, scale_shift, groups, eps=1e-5):
    y = jax.lax.conv_general_dilated(
        x.astype(jnp.float32), weight.astype(jnp.float32),
        window_strides=(1, 1), padding=((1, 1), (1, 1)),
        dimension_numbers=("NCHW", "OIHW", "NCHW"),
        precision=jax.lax.Precision.HIGHEST)
    y = y + bias[None, :, None, None]
    B, C, H, W = y.shape
    yg = y.reshape(B, groups, C // groups, H, W)
    mean = yg.mean(axis=(2, 3, 4), keepdims=True)
    var = yg.var(axis=(2, 3, 4), keepdims=True)
    yn = ((yg - mean) * jax.lax.rsqrt(var + eps)).reshape(B, C, H, W)
    yn = yn * gamma[None, :, None, None] + beta[None, :, None, None]
    if scale_shift is not None:
        s, t = scale_shift
        yn = yn * (s + 1.0) + t
    return yn * jax.nn.sigmoid(yn)


if __name__ == "__main__":
    key = jax.random.PRNGKey(0)
    B, C_in, C_out, H, W, GROUPS = 2, 4, 16, 16, 16, 8
    k1, k2, k3, k4, k5, k6, k7 = jax.random.split(key, 7)

    x = jax.random.normal(k1, (B, C_in, H, W), jnp.float32)
    weight = 0.2 * jax.random.normal(k2, (C_out, C_in, 3, 3), jnp.float32)
    bias = 0.1 * jax.random.normal(k3, (C_out,), jnp.float32)
    gamma = 1.0 + 0.1 * jax.random.normal(k4, (C_out,), jnp.float32)
    beta = 0.1 * jax.random.normal(k5, (C_out,), jnp.float32)
    scale = 0.1 * jax.random.normal(k6, (B, C_out, 1, 1), jnp.float32)
    shift = 0.1 * jax.random.normal(k7, (B, C_out, 1, 1), jnp.float32)

    # With scale_shift (the FiLM path used inside ResnetBlock).
    out = block_forward(x, weight, bias, gamma, beta,
                        scale_shift=(scale, shift), groups=GROUPS)
    out = jax.block_until_ready(out)
    ref = _reference(x, weight, bias, gamma, beta, (scale, shift), GROUPS)
    assert out.shape == (B, C_out, H, W), out.shape
    assert jnp.allclose(out, ref, atol=5e-3, rtol=5e-3), "mismatch (scale_shift)"

    # Without scale_shift (statically specialized variant).
    out2 = jax.block_until_ready(
        block_forward(x, weight, bias, gamma, beta, None, groups=GROUPS))
    ref2 = _reference(x, weight, bias, gamma, beta, None, GROUPS)
    assert jnp.allclose(out2, ref2, atol=5e-3, rtol=5e-3), "mismatch (no scale_shift)"

    print("KERNEL_OK")
</pallas_src>

<mosaic_0001>
module attributes {stable_mosaic.version = 11 : i64} {
  func.func @_block_kernel(%arg0: i32, %arg1: memref<1x4x384xf32, #tpu.memory_space<vmem>>, %arg2: memref<9x16x4xf32, #tpu.memory_space<vmem>>, %arg3: memref<16x1xf32, #tpu.memory_space<vmem>>, %arg4: memref<16x1xf32, #tpu.memory_space<vmem>>, %arg5: memref<16x1xf32, #tpu.memory_space<vmem>>, %arg6: memref<1x288xf32, #tpu.memory_space<vmem>>, %arg7: memref<16x16xf32, #tpu.memory_space<vmem>>, %arg8: memref<1x16x1xf32, #tpu.memory_space<vmem>>, %arg9: memref<1x16x1xf32, #tpu.memory_space<vmem>>, %arg10: memref<1x16x288xf32, #tpu.memory_space<vmem>>) attributes {dimension_semantics = [#tpu.dimension_semantics<parallel>], iteration_bounds = array<i64: 2>, scalar_prefetch = 0 : i64, scratch_operands = 0 : i64, tpu.core_type = #tpu.core_type<tc>, window_params = [{transform_indices = @transform_0, window_bounds = array<i64: 1, 4, 384>}, {pipeline_mode = #tpu.pipeline_mode<synchronous>, transform_indices = @transform_1, window_bounds = array<i64: 9, 16, 4>}, {pipeline_mode = #tpu.pipeline_mode<synchronous>, transform_indices = @transform_2, window_bounds = array<i64: 16, 1>}, {pipeline_mode = #tpu.pipeline_mode<synchronous>, transform_indices = @transform_3, window_bounds = array<i64: 16, 1>}, {pipeline_mode = #tpu.pipeline_mode<synchronous>, transform_indices = @transform_4, window_bounds = array<i64: 16, 1>}, {pipeline_mode = #tpu.pipeline_mode<synchronous>, transform_indices = @transform_5, window_bounds = array<i64: 1, 288>}, {pipeline_mode = #tpu.pipeline_mode<synchronous>, transform_indices = @transform_6, window_bounds = array<i64: 16, 16>}, {transform_indices = @transform_7, window_bounds = array<i64: 1, 16, 1>}, {transform_indices = @transform_8, window_bounds = array<i64: 1, 16, 1>}, {transform_indices = @transform_9, window_bounds = array<i64: 1, 16, 288>}]} {
    %c0 = arith.constant 0 : index
    %c0_0 = arith.constant 0 : index
    %c0_1 = arith.constant 0 : index
    %0 = vector.load %arg1[%c0, %c0_0, %c0_1] : memref<1x4x384xf32, #tpu.memory_space<vmem>>, vector<1x4x384xf32>
    %1 = vector.shape_cast %0 : vector<1x4x384xf32> to vector<4x384xf32>
    %c0_2 = arith.constant 0 : index
    %c0_3 = arith.constant 0 : index
    %c0_4 = arith.constant 0 : index
    %2 = vector.load %arg2[%c0_2, %c0_3, %c0_4] : memref<9x16x4xf32, #tpu.memory_space<vmem>>, vector<1x16x4xf32>
    %3 = vector.shape_cast %2 : vector<1x16x4xf32> to vector<16x4xf32>
    %4 = vector.extract_strided_slice %1 {offsets = [0, 0], sizes = [4, 288], strides = [1, 1]} : vector<4x384xf32> to vector<4x288xf32>
    %cst = arith.constant dense<0.000000e+00> : vector<16x288xf32>
    %5 = tpu.matmul %3, %4, %cst {dimension_numbers = #tpu.dot_dimension_numbers<[1], [0], [0], [1], [0, 0, 1, 1], [], []>} : vector<16x4xf32>, vector<4x288xf32>, vector<16x288xf32> -> vector<16x288xf32>
    %c0_5 = arith.constant 0 : index
    %c0_6 = arith.constant 0 : index
    %6 = vector.load %arg3[%c0_5, %c0_6] : memref<16x1xf32, #tpu.memory_space<vmem>>, vector<16x1xf32>
    %7 = vector.broadcast %6 : vector<16x1xf32> to vector<16x288xf32>
    %8 = arith.addf %5, %7 : vector<16x288xf32>
    %c1 = arith.constant 1 : index
    %c0_7 = arith.constant 0 : index
    %c0_8 = arith.constant 0 : index
    %9 = vector.load %arg2[%c1, %c0_7, %c0_8] : memref<9x16x4xf32, #tpu.memory_space<vmem>>, vector<1x16x4xf32>
    %10 = vector.shape_cast %9 : vector<1x16x4xf32> to vector<16x4xf32>
    %11 = vector.extract_strided_slice %1 {offsets = [0, 1], sizes = [4, 288], strides = [1, 1]} : vector<4x384xf32> to vector<4x288xf32>
    %cst_9 = arith.constant dense<0.000000e+00> : vector<16x288xf32>
    %12 = tpu.matmul %10, %11, %cst_9 {dimension_numbers = #tpu.dot_dimension_numbers<[1], [0], [0], [1], [0, 0, 1, 1], [], []>} : vector<16x4xf32>, vector<4x288xf32>, vector<16x288xf32> -> vector<16x288xf32>
    %13 = arith.addf %8, %12 : vector<16x288xf32>
    %c2 = arith.constant 2 : index
    %c0_10 = arith.constant 0 : index
    %c0_11 = arith.constant 0 : index
    %14 = vector.load %arg2[%c2, %c0_10, %c0_11] : memref<9x16x4xf32, #tpu.memory_space<vmem>>, vector<1x16x4xf32>
    %15 = vector.shape_cast %14 : vector<1x16x4xf32> to vector<16x4xf32>
    %16 = vector.extract_strided_slice %1 {offsets = [0, 2], sizes = [4, 288], strides = [1, 1]} : vector<4x384xf32> to vector<4x288xf32>
    %cst_12 = arith.constant dense<0.000000e+00> : vector<16x288xf32>
    %17 = tpu.matmul %15, %16, %cst_12 {dimension_numbers = #tpu.dot_dimension_numbers<[1], [0], [0], [1], [0, 0, 1, 1], [], []>} : vector<16x4xf32>, vector<4x288xf32>, vector<16x288xf32> -> vector<16x288xf32>
    %18 = arith.addf %13, %17 : vector<16x288xf32>
    %c3 = arith.constant 3 : index
    %c0_13 = arith.constant 0 : index
    %c0_14 = arith.constant 0 : index
    %19 = vector.load %arg2[%c3, %c0_13, %c0_14] : memref<9x16x4xf32, #tpu.memory_space<vmem>>, vector<1x16x4xf32>
    %20 = vector.shape_cast %19 : vector<1x16x4xf32> to vector<16x4xf32>
    %21 = vector.extract_strided_slice %1 {offsets = [0, 18], sizes = [4, 288], strides = [1, 1]} : vector<4x384xf32> to vector<4x288xf32>
    %cst_15 = arith.constant dense<0.000000e+00> : vector<16x288xf32>
    %22 = tpu.matmul %20, %21, %cst_15 {dimension_numbers = #tpu.dot_dimension_numbers<[1], [0], [0], [1], [0, 0, 1, 1], [], []>} : vector<16x4xf32>, vector<4x288xf32>, vector<16x288xf32> -> vector<16x288xf32>
    %23 = arith.addf %18, %22 : vector<16x288xf32>
    %c4 = arith.constant 4 : index
    %c0_16 = arith.constant 0 : index
    %c0_17 = arith.constant 0 : index
    %24 = vector.load %arg2[%c4, %c0_16, %c0_17] : memref<9x16x4xf32, #tpu.memory_space<vmem>>, vector<1x16x4xf32>
    %25 = vector.shape_cast %24 : vector<1x16x4xf32> to vector<16x4xf32>
    %26 = vector.extract_strided_slice %1 {offsets = [0, 19], sizes = [4, 288], strides = [1, 1]} : vector<4x384xf32> to vector<4x288xf32>
    %cst_18 = arith.constant dense<0.000000e+00> : vector<16x288xf32>
    %27 = tpu.matmul %25, %26, %cst_18 {dimension_numbers = #tpu.dot_dimension_numbers<[1], [0], [0], [1], [0, 0, 1, 1], [], []>} : vector<16x4xf32>, vector<4x288xf32>, vector<16x288xf32> -> vector<16x288xf32>
    %28 = arith.addf %23, %27 : vector<16x288xf32>
    %c5 = arith.constant 5 : index
    %c0_19 = arith.constant 0 : index
    %c0_20 = arith.constant 0 : index
    %29 = vector.load %arg2[%c5, %c0_19, %c0_20] : memref<9x16x4xf32, #tpu.memory_space<vmem>>, vector<1x16x4xf32>
    %30 = vector.shape_cast %29 : vector<1x16x4xf32> to vector<16x4xf32>
    %31 = vector.extract_strided_slice %1 {offsets = [0, 20], sizes = [4, 288], strides = [1, 1]} : vector<4x384xf32> to vector<4x288xf32>
    %cst_21 = arith.constant dense<0.000000e+00> : vector<16x288xf32>
    %32 = tpu.matmul %30, %31, %cst_21 {dimension_numbers = #tpu.dot_dimension_numbers<[1], [0], [0], [1], [0, 0, 1, 1], [], []>} : vector<16x4xf32>, vector<4x288xf32>, vector<16x288xf32> -> vector<16x288xf32>
    %33 = arith.addf %28, %32 : vector<16x288xf32>
    %c6 = arith.constant 6 : index
    %c0_22 = arith.constant 0 : index
    %c0_23 = arith.constant 0 : index
    %34 = vector.load %arg2[%c6, %c0_22, %c0_23] : memref<9x16x4xf32, #tpu.memory_space<vmem>>, vector<1x16x4xf32>
    %35 = vector.shape_cast %34 : vector<1x16x4xf32> to vector<16x4xf32>
    %36 = vector.extract_strided_slice %1 {offsets = [0, 36], sizes = [4, 288], strides = [1, 1]} : vector<4x384xf32> to vector<4x288xf32>
    %cst_24 = arith.constant dense<0.000000e+00> : vector<16x288xf32>
    %37 = tpu.matmul %35, %36, %cst_24 {dimension_numbers = #tpu.dot_dimension_numbers<[1], [0], [0], [1], [0, 0, 1, 1], [], []>} : vector<16x4xf32>, vector<4x288xf32>, vector<16x288xf32> -> vector<16x288xf32>
    %38 = arith.addf %33, %37 : vector<16x288xf32>
    %c7 = arith.constant 7 : index
    %c0_25 = arith.constant 0 : index
    %c0_26 = arith.constant 0 : index
    %39 = vector.load %arg2[%c7, %c0_25, %c0_26] : memref<9x16x4xf32, #tpu.memory_space<vmem>>, vector<1x16x4xf32>
    %40 = vector.shape_cast %39 : vector<1x16x4xf32> to vector<16x4xf32>
    %41 = vector.extract_strided_slice %1 {offsets = [0, 37], sizes = [4, 288], strides = [1, 1]} : vector<4x384xf32> to vector<4x288xf32>
    %cst_27 = arith.constant dense<0.000000e+00> : vector<16x288xf32>
    %42 = tpu.matmul %40, %41, %cst_27 {dimension_numbers = #tpu.dot_dimension_numbers<[1], [0], [0], [1], [0, 0, 1, 1], [], []>} : vector<16x4xf32>, vector<4x288xf32>, vector<16x288xf32> -> vector<16x288xf32>
    %43 = arith.addf %38, %42 : vector<16x288xf32>
    %c8 = arith.constant 8 : index
    %c0_28 = arith.constant 0 : index
    %c0_29 = arith.constant 0 : index
    %44 = vector.load %arg2[%c8, %c0_28, %c0_29] : memref<9x16x4xf32, #tpu.memory_space<vmem>>, vector<1x16x4xf32>
    %45 = vector.shape_cast %44 : vector<1x16x4xf32> to vector<16x4xf32>
    %46 = vector.extract_strided_slice %1 {offsets = [0, 38], sizes = [4, 288], strides = [1, 1]} : vector<4x384xf32> to vector<4x288xf32>
    %cst_30 = arith.constant dense<0.000000e+00> : vector<16x288xf32>
    %47 = tpu.matmul %45, %46, %cst_30 {dimension_numbers = #tpu.dot_dimension_numbers<[1], [0], [0], [1], [0, 0, 1, 1], [], []>} : vector<16x4xf32>, vector<4x288xf32>, vector<16x288xf32> -> vector<16x288xf32>
    %48 = arith.addf %43, %47 : vector<16x288xf32>
    %c0_31 = arith.constant 0 : index
    %c0_32 = arith.constant 0 : index
    %49 = vector.load %arg6[%c0_31, %c0_32] : memref<1x288xf32, #tpu.memory_space<vmem>>, vector<1x288xf32>
    %50 = vector.broadcast %49 : vector<1x288xf32> to vector<16x288xf32>
    %51 = arith.mulf %48, %50 : vector<16x288xf32>
    %cst_33 = arith.constant dense<0.000000e+00> : vector<16xf32>
    %52 = vector.multi_reduction <add>, %51, %cst_33 [1] : vector<16x288xf32> to vector<16xf32>
    %53 = vector.shape_cast %52 : vector<16xf32> to vector<16x1xf32>
    %54 = arith.mulf %51, %48 : vector<16x288xf32>
    %cst_34 = arith.constant dense<0.000000e+00> : vector<16xf32>
    %55 = vector.multi_reduction <add>, %54, %cst_34 [1] : vector<16x288xf32> to vector<16xf32>
    %56 = vector.shape_cast %55 : vector<16xf32> to vector<16x1xf32>
    %c0_35 = arith.constant 0 : index
    %c0_36 = arith.constant 0 : index
    %57 = vector.load %arg7[%c0_35, %c0_36] : memref<16x16xf32, #tpu.memory_space<vmem>>, vector<16x16xf32>
    %cst_37 = arith.constant dense<0.000000e+00> : vector<16x1xf32>
    %58 = tpu.matmul %57, %53, %cst_37 {dimension_numbers = #tpu.dot_dimension_numbers<[1], [0], [0], [1], [0, 0, 1, 1], [], []>} : vector<16x16xf32>, vector<16x1xf32>, vector<16x1xf32> -> vector<16x1xf32>
    %cst_38 = arith.constant 0.001953125 : f32
    %59 = vector.broadcast %cst_38 : f32 to vector<16x1xf32>
    %60 = arith.mulf %58, %59 : vector<16x1xf32>
    %c0_39 = arith.constant 0 : index
    %c0_40 = arith.constant 0 : index
    %61 = vector.load %arg7[%c0_39, %c0_40] : memref<16x16xf32, #tpu.memory_space<vmem>>, vector<16x16xf32>
    %cst_41 = arith.constant dense<0.000000e+00> : vector<16x1xf32>
    %62 = tpu.matmul %61, %56, %cst_41 {dimension_numbers = #tpu.dot_dimension_numbers<[1], [0], [0], [1], [0, 0, 1, 1], [], []>} : vector<16x16xf32>, vector<16x1xf32>, vector<16x1xf32> -> vector<16x1xf32>
    %cst_42 = arith.constant 0.001953125 : f32
    %63 = vector.broadcast %cst_42 : f32 to vector<16x1xf32>
    %64 = arith.mulf %62, %63 : vector<16x1xf32>
    %65 = arith.mulf %60, %60 : vector<16x1xf32>
    %66 = arith.subf %64, %65 : vector<16x1xf32>
    %67 = vector.broadcast %60 : vector<16x1xf32> to vector<16x288xf32>
    %68 = arith.subf %48, %67 : vector<16x288xf32>
    %cst_43 = arith.constant 9.99999974E-6 : f32
    %69 = vector.broadcast %cst_43 : f32 to vector<16x1xf32>
    %70 = arith.addf %66, %69 : vector<16x1xf32>
    %71 = math.rsqrt %70 : vector<16x1xf32>
    %72 = vector.broadcast %71 : vector<16x1xf32> to vector<16x288xf32>
    %73 = arith.mulf %68, %72 : vector<16x288xf32>
    %c0_44 = arith.constant 0 : index
    %c0_45 = arith.constant 0 : index
    %74 = vector.load %arg4[%c0_44, %c0_45] : memref<16x1xf32, #tpu.memory_space<vmem>>, vector<16x1xf32>
    %75 = vector.broadcast %74 : vector<16x1xf32> to vector<16x288xf32>
    %76 = arith.mulf %73, %75 : vector<16x288xf32>
    %c0_46 = arith.constant 0 : index
    %c0_47 = arith.constant 0 : index
    %77 = vector.load %arg5[%c0_46, %c0_47] : memref<16x1xf32, #tpu.memory_space<vmem>>, vector<16x1xf32>
    %78 = vector.broadcast %77 : vector<16x1xf32> to vector<16x288xf32>
    %79 = arith.addf %76, %78 : vector<16x288xf32>
    %c0_48 = arith.constant 0 : index
    %c0_49 = arith.constant 0 : index
    %c0_50 = arith.constant 0 : index
    %80 = vector.load %arg8[%c0_48, %c0_49, %c0_50] : memref<1x16x1xf32, #tpu.memory_space<vmem>>, vector<1x16x1xf32>
    %81 = vector.shape_cast %80 : vector<1x16x1xf32> to vector<16x1xf32>
    %cst_51 = arith.constant 1.000000e+00 : f32
    %82 = vector.broadcast %cst_51 : f32 to vector<16x1xf32>
    %83 = arith.addf %81, %82 : vector<16x1xf32>
    %84 = vector.broadcast %83 : vector<16x1xf32> to vector<16x288xf32>
    %85 = arith.mulf %79, %84 : vector<16x288xf32>
    %c0_52 = arith.constant 0 : index
    %c0_53 = arith.constant 0 : index
    %c0_54 = arith.constant 0 : index
    %86 = vector.load %arg9[%c0_52, %c0_53, %c0_54] : memref<1x16x1xf32, #tpu.memory_space<vmem>>, vector<1x16x1xf32>
    %87 = vector.shape_cast %86 : vector<1x16x1xf32> to vector<16x1xf32>
    %88 = vector.broadcast %87 : vector<16x1xf32> to vector<16x288xf32>
    %89 = arith.addf %85, %88 : vector<16x288xf32>
    %cst_55 = arith.constant 0.000000e+00 : f32
    %90 = vector.broadcast %cst_55 : f32 to vector<16x288xf32>
    %91 = arith.subf %90, %89 : vector<16x288xf32>
    %92 = math.exp %91 : vector<16x288xf32>
    %cst_56 = arith.constant 1.000000e+00 : f32
    %93 = vector.broadcast %cst_56 : f32 to vector<16x288xf32>
    %94 = arith.addf %93, %92 : vector<16x288xf32>
    %95 = tpu.reciprocal %94 {approx = true} : vector<16x288xf32> -> vector<16x288xf32>
    %96 = arith.mulf %89, %95 : vector<16x288xf32>
    %c0_57 = arith.constant 0 : index
    %c0_58 = arith.constant 0 : index
    %c0_59 = arith.constant 0 : index
    %97 = vector.load %arg10[%c0_57, %c0_58, %c0_59] : memref<1x16x288xf32, #tpu.memory_space<vmem>>, vector<1x16x288xf32>
    %98 = vector.shape_cast %97 : vector<1x16x288xf32> to vector<16x288xf32>
    %99 = vector.shape_cast %96 : vector<16x288xf32> to vector<1x16x288xf32>
    tpu.vector_store %arg10[%c0_57, %c0_58, %c0_59], %99 {strides = array<i32>} : memref<1x16x288xf32, #tpu.memory_space<vmem>>, vector<1x16x288xf32>,
    return
  }
  func.func @transform_0(%arg0: i32) -> (i32, i32, i32) {
    %c0_i32 = arith.constant 0 : i32
    %c0_i32_0 = arith.constant 0 : i32
    %c0_i32_1 = arith.constant 0 : i32
    return %arg0, %c0_i32, %c0_i32_0 : i32, i32, i32
  }
  func.func @transform_1(%arg0: i32) -> (i32, i32, i32) {
    %c0_i32 = arith.constant 0 : i32
    %c0_i32_0 = arith.constant 0 : i32
    %c0_i32_1 = arith.constant 0 : i32
    %c0_i32_2 = arith.constant 0 : i32
    return %c0_i32, %c0_i32_0, %c0_i32_1 : i32, i32, i32
  }
  func.func @transform_2(%arg0: i32) -> (i32, i32) {
    %c0_i32 = arith.constant 0 : i32
    %c0_i32_0 = arith.constant 0 : i32
    %c0_i32_1 = arith.constant 0 : i32
    return %c0_i32, %c0_i32_0 : i32, i32
  }
  func.func @transform_3(%arg0: i32) -> (i32, i32) {
    %c0_i32 = arith.constant 0 : i32
    %c0_i32_0 = arith.constant 0 : i32
    %c0_i32_1 = arith.constant 0 : i32
    return %c0_i32, %c0_i32_0 : i32, i32
  }
  func.func @transform_4(%arg0: i32) -> (i32, i32) {
    %c0_i32 = arith.constant 0 : i32
    %c0_i32_0 = arith.constant 0 : i32
    %c0_i32_1 = arith.constant 0 : i32
    return %c0_i32, %c0_i32_0 : i32, i32
  }
  func.func @transform_5(%arg0: i32) -> (i32, i32) {
    %c0_i32 = arith.constant 0 : i32
    %c0_i32_0 = arith.constant 0 : i32
    %c0_i32_1 = arith.constant 0 : i32
    return %c0_i32, %c0_i32_0 : i32, i32
  }
  func.func @transform_6(%arg0: i32) -> (i32, i32) {
    %c0_i32 = arith.constant 0 : i32
    %c0_i32_0 = arith.constant 0 : i32
    %c0_i32_1 = arith.constant 0 : i32
    return %c0_i32, %c0_i32_0 : i32, i32
  }
  func.func @transform_7(%arg0: i32) -> (i32, i32, i32) {
    %c0_i32 = arith.constant 0 : i32
    %c0_i32_0 = arith.constant 0 : i32
    %c0_i32_1 = arith.constant 0 : i32
    return %arg0, %c0_i32, %c0_i32_0 : i32, i32, i32
  }
  func.func @transform_8(%arg0: i32) -> (i32, i32, i32) {
    %c0_i32 = arith.constant 0 : i32
    %c0_i32_0 = arith.constant 0 : i32
    %c0_i32_1 = arith.constant 0 : i32
    return %arg0, %c0_i32, %c0_i32_0 : i32, i32, i32
  }
  func.func @transform_9(%arg0: i32) -> (i32, i32, i32) {
    %c0_i32 = arith.constant 0 : i32
    %c0_i32_0 = arith.constant 0 : i32
    %c0_i32_1 = arith.constant 0 : i32
    return %arg0, %c0_i32, %c0_i32_0 : i32, i32, i32
  }
}

</mosaic_0001>

<bundles_post_ra>
// kernel: tpu_custom_call.1
= control target key start
LH: loop header
LB: loop body
LE: loop exit
PB: predicated region body
PF: predicated region fallthrough
CT: control target
= control target key end

     0   :  { %14 = vsyncpa [#allocation3], 0  ;;  %s3280_s0 = inlined_call_operand.vmem [shape: f32[2,4,384], index: 0, kind: input, shape index: {}]   ;;  %s3281_s1 = inlined_call_operand.vmem [shape: f32[9,16,4], index: 1, kind: input, shape index: {}]   ;;  %s3282_s2 = inlined_call_operand.vmem [shape: f32[16,1], index: 2, kind: input, shape index: {}]   ;;  %s3283_s3 = inlined_call_operand.vmem [shape: f32[16,1], index: 3, kind: input, shape index: {}]   ;;  %s3284_s4 = inlined_call_operand.vmem [shape: f32[16,1], index: 4, kind: input, shape index: {}]   ;;  %s3285_s5 = inlined_call_operand.vmem [shape: f32[1,288], index: 5, kind: input, shape index: {}]   ;;  %s3286_s6 = inlined_call_operand.vmem [shape: f32[16,16], index: 6, kind: input, shape index: {}]   ;;  %s3287_s7 = inlined_call_operand.vmem [shape: f32[2,16,1], index: 7, kind: input, shape index: {}]   ;;  %s3288_s8 = inlined_call_operand.vmem [shape: f32[2,16,1], index: 8, kind: input, shape index: {}]   ;;  %s3289_s9 = inlined_call_operand.hbm [shape: f32[2,16,288], index: 9, kind: output, shape index: {}]  }
   0x1   :  { %16 = vsyncpa [#allocation3 + $0x1], 0  ;;  %s2946_s30 = smov 0   ;;  %s2948_s10 = smov 0  }
   0x2   :  { %s2950_s11 = smov 0   ;;  %s2952_s12 = smov 0  }
   0x3 LB: > { %s2967_s13 = sadd.s32 4294967295, %s2881_s12   ;;  %s2481_s14 = sadd.s32 4294967294, %s2881_s12   ;;  %s2881_s12 = sphi %s2952_s12, %s3295_s12   ;;  %s2877_s11 = sphi %s2950_s11, %s3294_s11   ;;  %s2873_s10 = sphi %s2948_s10, %s3293_s10   ;;  %s2869_s30 = sphi %s2946_s30, %s3292_s30  }
   0x4   : > { %s2971_s15 = sadd.s32 1, %s2881_s12   ;;  %s233_s16 = sadd.s32 1, %s2877_s11 }
   0x5   : > { %s230_s17 = ssub.s32 %s2881_s12, %s2971_s15  ;;  %p243_p0 = scmp.ne.s32.totalorder %s2877_s11, %s2873_s10 }
   0x6   : > { %p231_p1 = scmp.eq.s32.totalorder %s230_s17, 0  ;;  %p244_p2 = scmp.eq.s32.totalorder %s2967_s13, 1 }
   0x7   : > { %p249_p3 = scmp.ne.s32.totalorder %s2873_s10, %s2869_s30  ;;  %p250_p4 = scmp.eq.s32.totalorder %s2481_s14, 1 }
   0x8   : > { %s2982_s18 = scalar_select %p231_p1, %s2877_s11, %s233_s16  }
   0x9   : > { %p2984_p5 = por %p244_p2, %p243_p0  ;;  %p2988_p6 = por %p250_p4, %p249_p3 }
   0xa   : > { %p2484_p7 = scmp.ge.s32.totalorder %s2881_s12, 1  ;;  %p310_p8 = scmp.lt.s32.totalorder %s2881_s12, 3 }
   0xc   : > { %p311_p9 = pnand %p2484_p7, %p310_p8 }
   0xd   : > { %p356_p10 = scmp.lt.s32.totalorder (!%p311_p9), %s2967_s13, 1  ;;  %v2883_v0 = vmov (!%p311_p9), 0.0   ;;  %vm397_vm0 = vcmask (!%p311_p9), 1043456   ;;  %s2884_s26 = smov (!%p311_p9), 127   ;;  %v373_v3 = vld [vmem:[%s3281_s1] sm:$0xff] (!%p311_p9)  ;;  %vm390_vm1 = vcmask (!%p311_p9), 31744  }
   0xe   : > { %314 = sbr.rel (%p311_p9) target bundleno = 1004 (0x3ec), region = 56  ;;  %468 = vmatprep.mubr.f32.mxu1 (!%p311_p9), %v2883_v0  ;;  %826 = vmatprep.mubr.f32.mxu0 (!%p311_p9), %v2883_v0  ;;  %s2885_s29 = smov (!%p311_p9), 126   ;;  %v374_v5 = vld [vmem:[%s3281_s1 + $0x8] sm:$0xff] (!%p311_p9)  ;;  %v375_v6 = vld [vmem:[%s3282_s2] sm:$0xff] (!%p311_p9)  ;;  %v2892_v8 = vmov (!%p311_p9), 0   ;;  %vm565_vm2 = vcmask (!%p311_p9), 1039360  }
   0xf   : > { %s2886_s17 = smov (!%p311_p9), 110   ;;  %s2888_s23 = smov (!%p311_p9), 108   ;;  %v376_v7 = vld [vmem:[%s3282_s2 + $0x8] sm:$0xff] (!%p311_p9)  ;;  %2788 = vset.pattern.permute.xlu0 (!%p311_p9), %v2892_v8  ;;  %2789 = vset.pattern.permute.xlu1 (!%p311_p9), %v2892_v8  ;;  %v2497_v14 = vld [vmem:[%s3281_s1 + $0x10] sm:$0xff] (!%p311_p9)  ;;  %vm747_vm3 = vcmask (!%p311_p9), 1031168   ;;  %v2506_v20 = vld [vmem:[%s3281_s1 + $0x20] sm:$0xff] (!%p311_p9) }
  0x10   : > { %s2889_s24 = smov (!%p311_p9), 92   ;;  %v2498_v21 = vld [vmem:[%s3281_s1 + $0x18] sm:$0xff] (!%p311_p9)  ;;  %vm929_vm4 = vcmask (!%p311_p9), 900096   ;;  %v2507_v24 = vld [vmem:[%s3281_s1 + $0x28] sm:$0xff] (!%p311_p9)  ;;  %v2515_v29 = vld [vmem:[%s3281_s1 + $0x30] sm:$0xff] (!%p311_p9)  ;;  %vm1111_vm5 = vcmask (!%p311_p9), 891904  }
  0x11   : > { %v2516_v33 = vld [vmem:[%s3281_s1 + $0x38] sm:$0xff] (!%p311_p9)  ;;  %vm1293_vm6 = vcmask (!%p311_p9), 883712   ;;  %v2524_v37 = vld [vmem:[%s3281_s1 + $0x40] sm:$0xff] (!%p311_p9)  ;;  %v2525_v41 = vld [vmem:[%s3281_s1 + $0x48] sm:$0xff] (!%p311_p9)  ;;  %vm1475_vm7 = vcmask (!%p311_p9), 752640   ;;  %vm1657_vm8 = vcmask (!%p311_p9), 744448  }
  0x12   : > { %v2533_v45 = vld [vmem:[%s3281_s1 + $0x50] sm:$0xff] (!%p311_p9)  ;;  %v2534_v50 = vld [vmem:[%s3281_s1 + $0x58] sm:$0xff] (!%p311_p9)  ;;  %v2542_v53 = vld [vmem:[%s3281_s1 + $0x60] sm:$0xff] (!%p311_p9)  ;;  %vm1839_vm9 = vcmask (!%p311_p9), 736256   ;;  %vm2036_vm10 = vcmask (!%p311_p9), 261120   ;;  %vm2064_vm11 = vcmask (!%p311_p9), 130048  }
  0x13   : > { %v2543_v57 = vld [vmem:[%s3281_s1 + $0x68] sm:$0xff] (!%p311_p9)  ;;  %v2551_v60 = vld [vmem:[%s3281_s1 + $0x70] sm:$0xff] (!%p311_p9)  ;;  %v2552_v62 = vld [vmem:[%s3281_s1 + $0x78] sm:$0xff] (!%p311_p9)  ;;  %s2736_s14 = smul.u32 (!%p311_p9), 768, %s2967_s13 }
  0x14   : > { %v2560_v63 = vld [vmem:[%s3281_s1 + $0x80] sm:$0xff] (!%p311_p9) }
  0x15   : > { %s2998_s21 = scalar_select %p356_p10, %s2967_s13, 1 }
  0x16   : > { %s3232_s13 = scalar_lea.hbm %s3289_s9, %s2736_s14 }
  0x17   : > { %s2735_s22 = smul.u32 12, %s2998_s21 }
  0x19   : > { %s360_s25 = scalar_lea.vmem %s3280_s0, %s2735_s22  ;;  %s2887_s22 = smov 109  }
  0x1a   : > { %v371_v1 = vld [vmem:[%s360_s25] sm:$0xff]  ;;  %v372_v4 = vld [vmem:[%s360_s25 + $0x8] sm:$0xf]  ;;  %s2890_s25 = smov 91  }
  0x1b   : > { %559 = vrot.lane.b32.xlu1 %v371_v1, %s2884_s26  ;;  %v389_v2 = vcombine.high %v371_v1, %v371_v1 }
  0x1d   : > { %561 = vrot.lane.b32.xlu0 %v389_v2, %s2884_s26  ;;  %2490 = vmatprep.subr.msk.mxu1 %vm397_vm0, %v389_v2 }
  0x1e   : > { %2491 = vmatpush1.msk.msra.mxu1 %vm397_vm0, %v371_v1 }
  0x1f   : > { %743 = vrot.lane.b32.xlu1 %v389_v2, %s2885_s29  ;;  %2492 = vmatmul.mubr.msk.f32.vlgmr.msra.gmra.mrb[0].mxu1 %vm390_vm1, %v373_v3 }
  0x20   : > { %2613 = vmatprep.subr.msk.mxu1 %vm397_vm0, %v372_v4  ;;  %474 = vmatprep.mubr.f32.mxu1 %v2883_v0 }
  0x21   : > { %563 = vrot.lane.b32.xlu0 %v372_v4, %s2884_s26  ;;  %2614 = vmatpush3.msk.msra.mxu1 %vm397_vm0, %v372_v4  ;;  %s2891_s26 = smov 90  }
  0x23   : > { %741 = vrot.lane.b32.xlu1 %v371_v1, %s2885_s29  ;;  %2493 = vmatmul.mubr.msk.f32.gmra.mrb[2].mxu1 %vm390_vm1, %v374_v5 }
  0x24   : > { %2615 = vmatprep.mubr.msk.f32.mxu1 %vm390_vm1, %v373_v3 }
  0x25   : > { %745 = vrot.lane.b32.xlu0 %v372_v4, %s2885_s29 }
  0x27   : > { %927 = vrot.lane.b32.xlu1 %v372_v4, %s2886_s17  ;;  %2616 = vmatmul.mubr.msk.f32.vlgmr.msra.gmra.mrb[4].mxu1 %vm390_vm1, %v374_v5 }
  0x28   : > { %644 = vmatprep.mubr.f32.mxu1 %v2883_v0 }
  0x29   : > { %925 = vrot.lane.b32.xlu0 %v389_v2, %s2886_s17 }
  0x2b   : > { %1107 = vrot.lane.b32.xlu1 %v389_v2, %s2887_s22 }
  0x2d   : > { %923 = vrot.lane.b32.xlu0 %v371_v1, %s2886_s17 }
  0x2f   : > { %1105 = vrot.lane.b32.xlu1 %v371_v1, %s2887_s22 }
  0x31   : > { %1109 = vrot.lane.b32.xlu0 %v372_v4, %s2887_s22  ;;  %s2576_s22 = sshll.u32 %s2998_s21, 4  ;;  %s353_s21 = sand.u32 1, %s2873_s10  }
  0x32   : > { %s370_s28 = scalar_lea.vmem %s3288_s8, %s2576_s22  ;;  %s2734_s29 = smul.u32 48, %s353_s21 }
  0x33   : > { %1291 = vrot.lane.b32.xlu1 %v372_v4, %s2888_s23 }
  0x34   : > { %s355_s16 = scalar_lea.vmem [#allocation2], %s2734_s29 }
  0x35   : > { %1289 = vrot.lane.b32.xlu0 %v389_v2, %s2888_s23  ;;  %s2395_s17 = sshll.u32 %s355_s16, 4  ;;  %s3234_s17 = int_to_ptr.vmem [resolvable:$true] %s2395_s17 }
  0x37   : > { %1471 = vrot.lane.b32.xlu1 %v389_v2, %s2889_s24 }
  0x39   : > { %1287 = vrot.lane.b32.xlu0 %v371_v1, %s2888_s23 }
  0x3b   : > { %1469 = vrot.lane.b32.xlu1 %v371_v1, %s2889_s24 }
  0x3d   : > { %1473 = vrot.lane.b32.xlu0 %v372_v4, %s2889_s24  ;;  %s3239_s24 = scalar_lea.sflag [#allocation3], %s353_s21 }
  0x3f   : > { %1655 = vrot.lane.b32.xlu1 %v372_v4, %s2890_s25 }
  0x41   : > { %1653 = vrot.lane.b32.xlu0 %v389_v2, %s2890_s25 }
  0x43   : > { %1835 = vrot.lane.b32.xlu1 %v389_v2, %s2891_s26 }
  0x45   : > { %1651 = vrot.lane.b32.xlu0 %v371_v1, %s2890_s25  ;;  %s365_s25 = scalar_lea.vmem %s3287_s7, %s2576_s22 }
  0x47   : > { %1833 = vrot.lane.b32.xlu1 %v371_v1, %s2891_s26  ;;  %v2561_v1 = vld [vmem:[%s3281_s1 + $0x88] sm:$0xff] }
  0x49   : > { %1837 = vrot.lane.b32.xlu0 %v372_v4, %s2891_s26  ;;  %s2893_s26 = smov [#allocation2]  }
  0x4a   : > { %s2823_s27 = sshll.u32 %s2893_s26, 4  ;;  %s2824_s27 = int_to_ptr.vmem [resolvable:$false] %s2823_s27 }
  0x4b   : > { %384 = vperm.xlu1 %2789, %v376_v7   ;;  %p2826_p0 = scmp.lt.s32.totalorder %s3234_s17, %s2824_s27 }
  0x4d   : > { %379 = vperm.xlu0 %2788, %v375_v6   ;;  %v2014_v6 = vlaneseq }
  0x4f   : > { %v2015_v8 = vshrl.u32 %v2014_v6, 7 }
  0x8d   : > { %v560_v9 = vpop.permute.xlu1 %559 }
  0x8f   : > { %v562_v10 = vpop.permute.xlu0 %561 }
  0x90   : > { %v566_v15 = vsel %vm565_vm2, %v560_v9, %v562_v10 }
  0x91   : > { %v744_v11 = vpop.permute.xlu1 %743 }
  0x93   : > { %v564_v12 = vpop.permute.xlu0 %563 }
  0x94   : > { %v567_v13 = vsel %vm565_vm2, %v562_v10, %v564_v12 }
  0x95   : > { %2499 = vmatprep.subr.msk.mxu1 %vm397_vm0, %v567_v13  ;;  %v742_v16 = vpop.permute.xlu1 %741 }
  0x96   : > { %2500 = vmatpush1.msk.msra.mxu1 %vm397_vm0, %v566_v15  ;;  %v748_v18 = vsel %vm747_vm3, %v742_v16, %v744_v11  ;;  %v2016_v16 = vsub.s32 0, %v2015_v8 }
  0x97   : > { %v746_v17 = vpop.permute.xlu0 %745  ;;  %2501 = vmatmul.mubr.msk.f32.vlgmr.msra.gmra.mrb[0].mxu1 %vm390_vm1, %v2497_v14  ;;  %2618 = vmatprep.subr.msk.mxu1 %vm397_vm0, %v564_v12 }
  0x98   : > { %2619 = vmatpush3.msk.msra.mxu1 %vm397_vm0, %v564_v12  ;;  %v749_v19 = vsel %vm747_vm3, %v744_v11, %v746_v17  ;;  %650 = vmatprep.mubr.f32.mxu1 %v2883_v0 }
  0x99   : > { %2508 = vmatprep.subr.msk.mxu0 %vm397_vm0, %v749_v19  ;;  %2623 = vmatprep.subr.msk.mxu1 %vm397_vm0, %v746_v17  ;;  %v928_v22 = vpop.permute.xlu1 %927  ;;  %v2012_v19 = vld [vmem:[%s3285_s5] sm:$0x7] }
  0x9a   : > { %2509 = vmatpush1.msk.msra.mxu0 %vm397_vm0, %v748_v18 }
  0x9b   : > { %2510 = vmatmul.mubr.msk.f32.vlgmr.msra.gmra.mrb[0].mxu0 %vm390_vm1, %v2506_v20  ;;  %v926_v23 = vpop.permute.xlu0 %925  ;;  %2502 = vmatmul.mubr.msk.f32.gmra.mrb[2].mxu1 %vm390_vm1, %v2498_v21 }
  0x9c   : > { %2620 = vmatprep.mubr.msk.f32.mxu1 %vm390_vm1, %v2497_v14  ;;  %832 = vmatprep.mubr.f32.mxu0 %v2883_v0  ;;  %v931_v25 = vsel %vm929_vm4, %v926_v23, %v928_v22 }
  0x9d   : > { %2517 = vmatprep.subr.msk.mxu0 %vm397_vm0, %v931_v25  ;;  %v1108_v26 = vpop.permute.xlu1 %1107 }
  0x9f   : > { %2511 = vmatmul.mubr.msk.f32.gmra.mrb[2].mxu0 %vm390_vm1, %v2507_v24  ;;  %v924_v27 = vpop.permute.xlu0 %923  ;;  %2621 = vmatmul.mubr.msk.f32.vlgmr.msra.gmra.mrb[4].mxu1 %vm390_vm1, %v2498_v21 }
  0xa0   : > { %v930_v28 = vsel %vm929_vm4, %v924_v27, %v926_v23  ;;  %2624 = vmatpush3.msk.msra.mxu1 %vm397_vm0, %v746_v17  ;;  %1008 = vmatprep.mubr.f32.mxu0 %v2883_v0  ;;  %v2020_v17 = vsub.s32 1, %v2015_v8 }
  0xa1   : > { %2518 = vmatpush1.msk.msra.mxu0 %vm397_vm0, %v930_v28  ;;  %2628 = vmatprep.subr.msk.mxu1 %vm397_vm0, %v928_v22  ;;  %v1106_v30 = vpop.permute.xlu1 %1105 }
  0xa2   : > { %2625 = vmatprep.mubr.msk.f32.mxu1 %vm390_vm1, %v2506_v20  ;;  %v1112_v32 = vsel %vm1111_vm5, %v1106_v30, %v1108_v26  ;;  %v2021_v25 = vrot.slane %v2012_v19, %v2020_v17 }
  0xa3   : > { %2519 = vmatmul.mubr.msk.f32.vlgmr.msra.gmra.mrb[0].mxu0 %vm390_vm1, %v2515_v29  ;;  %v1110_v31 = vpop.permute.xlu0 %1109 }
  0xa4   : > { %1014 = vmatprep.mubr.f32.mxu0 %v2883_v0  ;;  %v1113_v34 = vsel %vm1111_vm5, %v1108_v26, %v1110_v31  ;;  %v2024_v26 = vsub.s32 2, %v2015_v8 }
  0xa5   : > { %2526 = vmatprep.subr.msk.mxu0 %vm397_vm0, %v1113_v34  ;;  %v1292_v35 = vpop.permute.xlu1 %1291 }
  0xa6   : > { %2527 = vmatpush1.msk.msra.mxu0 %vm397_vm0, %v1112_v32 }
  0xa7   : > { %2626 = vmatmul.mubr.msk.f32.vlgmr.msra.gmra.mrb[4].mxu1 %vm390_vm1, %v2507_v24  ;;  %2520 = vmatmul.mubr.msk.f32.gmra.mrb[2].mxu0 %vm390_vm1, %v2516_v33  ;;  %v1290_v36 = vpop.permute.xlu0 %1289  ;;  %v2017_v24 = vrot.slane %v2012_v19, %v2016_v16 }
  0xa8   : > { %2629 = vmatpush3.msk.msra.mxu1 %vm397_vm0, %v928_v22  ;;  %1190 = vmatprep.mubr.f32.mxu0 %v2883_v0  ;;  %v1295_v38 = vsel %vm1293_vm6, %v1290_v36, %v1292_v35 }
  0xa9   : > { %2633 = vmatprep.subr.msk.mxu1 %vm397_vm0, %v1110_v31  ;;  %2630 = vmatprep.mubr.msk.f32.mxu1 %vm390_vm1, %v2515_v29  ;;  %v1472_v39 = vpop.permute.xlu1 %1471  ;;  %v2025_v29 = vrot.slane %v2012_v19, %v2024_v26 }
  0xaa   : > { %2535 = vmatprep.subr.msk.mxu0 %vm397_vm0, %v1295_v38 }
  0xab   : > { %2528 = vmatmul.mubr.msk.f32.vlgmr.msra.gmra.mrb[0].mxu0 %vm390_vm1, %v2524_v37  ;;  %v1288_v40 = vpop.permute.xlu0 %1287 }
  0xac   : > { %1196 = vmatprep.mubr.f32.mxu0 %v2883_v0  ;;  %v1294_v42 = vsel %vm1293_vm6, %v1288_v40, %v1290_v36 }
  0xad   : > { %2536 = vmatpush1.msk.msra.mxu0 %vm397_vm0, %v1294_v42  ;;  %v1470_v43 = vpop.permute.xlu1 %1469 }
  0xae   : > { %v1476_v47 = vsel %vm1475_vm7, %v1470_v43, %v1472_v39 }
  0xaf   : > { %2529 = vmatmul.mubr.msk.f32.gmra.mrb[2].mxu0 %vm390_vm1, %v2525_v41  ;;  %2631 = vmatmul.mubr.msk.f32.vlgmr.msra.gmra.mrb[4].mxu1 %vm390_vm1, %v2516_v33  ;;  %v1474_v44 = vpop.permute.xlu0 %1473 }
  0xb0   : > { %2634 = vmatpush3.msk.msra.mxu1 %vm397_vm0, %v1110_v31  ;;  %1372 = vmatprep.mubr.f32.mxu0 %v2883_v0  ;;  %v1477_v46 = vsel %vm1475_vm7, %v1472_v39, %v1474_v44 }
  0xb1   : > { %2638 = vmatprep.subr.msk.mxu1 %vm397_vm0, %v1292_v35  ;;  %2635 = vmatprep.mubr.msk.f32.mxu1 %vm390_vm1, %v2524_v37  ;;  %v1656_v48 = vpop.permute.xlu1 %1655 }
  0xb2   : > { %2544 = vmatprep.subr.msk.mxu0 %vm397_vm0, %v1477_v46 }
  0xb3   : > { %2537 = vmatmul.mubr.msk.f32.vlgmr.msra.gmra.mrb[0].mxu0 %vm390_vm1, %v2533_v45  ;;  %v1654_v49 = vpop.permute.xlu0 %1653 }
  0xb4   : > { %1378 = vmatprep.mubr.f32.mxu0 %v2883_v0  ;;  %2545 = vmatpush1.msk.msra.mxu0 %vm397_vm0, %v1476_v47  ;;  %v1659_v51 = vsel %vm1657_vm8, %v1654_v49, %v1656_v48 }
  0xb5   : > { %2553 = vmatprep.subr.msk.mxu0 %vm397_vm0, %v1659_v51  ;;  %v1836_v54 = vpop.permute.xlu1 %1835 }
  0xb7   : > { %2636 = vmatmul.mubr.msk.f32.vlgmr.msra.gmra.mrb[4].mxu1 %vm390_vm1, %v2525_v41  ;;  %2538 = vmatmul.mubr.msk.f32.gmra.mrb[2].mxu0 %vm390_vm1, %v2534_v50  ;;  %v1652_v52 = vpop.permute.xlu0 %1651 }
  0xb8   : > { %2639 = vmatpush3.msk.msra.mxu1 %vm397_vm0, %v1292_v35  ;;  %1554 = vmatprep.mubr.f32.mxu0 %v2883_v0  ;;  %v1658_v55 = vsel %vm1657_vm8, %v1652_v52, %v1654_v49 }
  0xb9   : > { %2643 = vmatprep.subr.msk.mxu1 %vm397_vm0, %v1474_v44  ;;  %2640 = vmatprep.mubr.msk.f32.mxu1 %vm390_vm1, %v2533_v45  ;;  %v1834_v59 = vpop.permute.xlu1 %1833 }
  0xba   : > { %v1840_v61 = vsel %vm1839_vm9, %v1834_v59, %v1836_v54  ;;  %v2283_v59 = vld [vmem:[%s3284_s4] sm:$0xff] }
  0xbb   : > { %2546 = vmatmul.mubr.msk.f32.vlgmr.msra.gmra.mrb[0].mxu0 %vm390_vm1, %v2542_v53  ;;  %v1838_v56 = vpop.permute.xlu0 %1837 }
  0xbc   : > { %1560 = vmatprep.mubr.f32.mxu0 %v2883_v0  ;;  %2554 = vmatpush1.msk.msra.mxu0 %vm397_vm0, %v1658_v55  ;;  %v1841_v58 = vsel %vm1839_vm9, %v1836_v54, %v1838_v56 }
  0xbd   : > { %2562 = vmatprep.subr.msk.mxu0 %vm397_vm0, %v1841_v58  ;;  %v2266_v58 = vld [vmem:[%s3283_s3 + $0x8] sm:$0xff] }
  0xbf   : > { %2547 = vmatmul.mubr.msk.f32.gmra.mrb[2].mxu0 %vm390_vm1, %v2543_v57  ;;  %2641 = vmatmul.mubr.msk.f32.vlgmr.msra.gmra.mrb[4].mxu1 %vm390_vm1, %v2534_v50 }
  0xc0   : > { %2644 = vmatpush3.msk.msra.mxu1 %vm397_vm0, %v1474_v44  ;;  %1736 = vmatprep.mubr.f32.mxu0 %v2883_v0 }
  0xc1   : > { %2648 = vmatprep.subr.msk.mxu1 %vm397_vm0, %v1656_v48  ;;  %2645 = vmatprep.mubr.msk.f32.mxu1 %vm390_vm1, %v2542_v53 }
  0xc3   : > { %2555 = vmatmul.mubr.msk.f32.vlgmr.msra.gmra.mrb[0].mxu0 %vm390_vm1, %v2551_v60 }
  0xc4   : > { %1742 = vmatprep.mubr.f32.mxu0 %v2883_v0  ;;  %2563 = vmatpush1.msk.msra.mxu0 %vm397_vm0, %v1840_v61 }
  0xc7   : > { %2646 = vmatmul.mubr.msk.f32.vlgmr.msra.gmra.mrb[4].mxu1 %vm390_vm1, %v2543_v57  ;;  %2556 = vmatmul.mubr.msk.f32.gmra.mrb[2].mxu0 %vm390_vm1, %v2552_v62  ;;  %v2062_v57 = vld [vmem:[%s3286_s6] sm:$0xff] }
  0xc8   : > { %2649 = vmatpush3.msk.msra.mxu1 %vm397_vm0, %v1656_v48  ;;  %1918 = vmatprep.mubr.f32.mxu0 %v2883_v0 }
  0xc9   : > { %2653 = vmatprep.subr.msk.mxu1 %vm397_vm0, %v1838_v56  ;;  %2650 = vmatprep.mubr.msk.f32.mxu1 %vm390_vm1, %v2551_v60  ;;  %v2284_v60 = vld [vmem:[%s3284_s4 + $0x8] sm:$0xff] }
  0xca   : > { %v385_v10 = vpop.permute.xlu1 %384 }
  0xcb   : > { %2564 = vmatmul.mubr.msk.f32.vlgmr.msra.gmra.mrb[0].mxu0 %vm390_vm1, %v2560_v63 }
  0xcc   : > { %1924 = vmatprep.mubr.f32.mxu0 %v2883_v0  ;;  %v380_v0 = vpop.permute.xlu0 %379 }
  0xcf   : > { %2651 = vmatmul.mubr.msk.f32.vlgmr.msra.gmra.mrb[4].mxu1 %vm390_vm1, %v2552_v62  ;;  %2565 = vmatmul.mubr.msk.f32.gmra.mrb[2].mxu0 %vm390_vm1, %v2561_v1 }
  0xd0   : > { %2654 = vmatpush3.msk.msra.mxu1 %vm397_vm0, %v1838_v56  ;;  %2655 = vmatprep.mubr.msk.f32.mxu1 %vm390_vm1, %v2560_v63  ;;  %v2265_v56 = vld [vmem:[%s3283_s3] sm:$0xff] }
  0xd7   : > { %2656 = vmatmul.mubr.msk.f32.vlgmr.msra.gmra.mrb[4].mxu1 %vm390_vm1, %v2561_v1 }
  0xd8   : > { %2662 = vmatprep.mubr.msk.f32.mxu1 %vm2064_vm11, %v2062_v57 }
 0x16a   : > { %v646_v2 = vpop.f32.mrb[0].mxu1 }
 0x16b   : > { %v648_v3 = vpop.f32.mrb[1].mxu1  ;;  %v2680_v7 = vadd.f32 %v646_v2, %v380_v0 }
 0x16c   : > { %v2682_v9 = vadd.f32 %v648_v3, %v380_v0  ;;  %v2063_v3 = vld [vmem:[%s3286_s6 + $0x8] sm:$0xff] }
 0x16e   : > { %v652_v4 = vpop.f32.mrb[2].mxu1 }
 0x16f   : > { %v654_v5 = vpop.f32.mrb[3].mxu1  ;;  %v2684_v15 = vadd.f32 %v652_v4, %v385_v10 }
 0x170   : > { %v2686_v18 = vadd.f32 %v654_v5, %v385_v10 }
 0x19e   : > { %v1920_v11 = vpop.f32.mrb[0].mxu0 }
 0x19f   : > { %v3158_v12 = vadd.f32 %v2680_v7, %v1920_v11  ;;  %v1922_v13 = vpop.f32.mrb[1].mxu0 }
 0x1a0   : > { %v3160_v14 = vadd.f32 %v2682_v9, %v1922_v13 }
 0x1a1   : > { %v2029_v27 = vmul.f32 %v3158_v12, %v2017_v24 }
 0x1a2   : > { %v1926_v20 = vpop.f32.mrb[2].mxu0  ;;  %v2030_v28 = vmul.f32 %v3160_v14, %v2021_v25 }
 0x1a3   : > { %v3165_v21 = vadd.f32 %v2684_v15, %v1926_v20  ;;  %v1928_v22 = vpop.f32.mrb[3].mxu0  ;;  %v2046_v36 = vmul.f32 %v3158_v12, %v2029_v27  ;;  %v2302_v20 = vld [vmem:[%s365_s25 + $0x8] sm:$0xff] }
 0x1a4   : > { %v3167_v23 = vadd.f32 %v2686_v18, %v1928_v22  ;;  %v2047_v37 = vmul.f32 %v3160_v14, %v2030_v28  ;;  %v2035_v41 = vadd.f32 %v2030_v28, %v2029_v27  ;;  %v2301_v22 = vld [vmem:[%s365_s25] sm:$0xff]  ;;  %v2304_v26 = vadd.f32 1.0, %v2302_v20  ;;  %v2322_v28 = vld [vmem:[%s370_s28 + $0x8] sm:$0xff]  ;;  %s2819_s25 = scalar_lea.vmem %s3234_s17, 768 }
 0x1a5   : > { %v2032_v30 = vmul.f32 %v3165_v21, %v2017_v24  ;;  %v2303_v27 = vadd.f32 1.0, %v2301_v22  ;;  %p2820_p11 = scmp.ne.s32.totalorder %s3234_s17, %s2819_s25 }
 0x1a6   : > { %v2033_v31 = vmul.f32 %v3167_v23, %v2021_v25  ;;  %v2052_v50 = vadd.f32 %v2047_v37, %v2046_v36 }
 0x1a7   : > { %v2049_v42 = vmul.f32 %v3165_v21, %v2032_v30  ;;  %p2821_p12 = pnand %p2820_p11, %p2984_p5 }
 0x1a8   : > { %v2041_v39 = vadd.f32 %v2033_v31, %v2032_v30  ;;  %v2050_v43 = vmul.f32 %v3167_v23, %v2033_v31 }
 0x1a9   : > { %p2822_p13 = pneg %p2821_p12 }
 0x1aa   : > { %v2657_v32 = vpop.f32.mrb[4].mxu1  ;;  %v2057_v54 = vadd.f32 %v2050_v43, %v2049_v42 }
 0x1ab   : > { %v3173_v33 = vadd.f32 %v2657_v32, %v385_v10  ;;  %v1997_v34 = vpop.f32.mrb[5].mxu1 }
 0x1ac   : > { %v3175_v35 = vadd.f32 %v1997_v34, %v380_v0 }
 0x1ad   : > { %v2034_v38 = vmul.f32 %v3173_v33, %v2025_v29 }
 0x1ae   : > { %v2031_v40 = vmul.f32 %v3175_v35, %v2025_v29  ;;  %v2321_v29 = vld [vmem:[%s370_s28] sm:$0xff]  ;;  %s2825_s28 = scalar_lea.vmem %s2824_s27, 1536 }
 0x1af   : > { %v2042_v44 = vsel %vm2036_vm10, %v2034_v38, 0.0  ;;  %v2051_v45 = vmul.f32 %v3173_v33, %v2034_v38  ;;  %p2827_p1 = scmp.lt.s32.totalorder %s2825_s28, %s2819_s25 }
 0x1b0   : > { %v2043_v46 = vadd.f32 %v2042_v44, %v2041_v39  ;;  %v2037_v47 = vsel %vm2036_vm10, %v2031_v40, 0.0  ;;  %v2048_v48 = vmul.f32 %v3175_v35, %v2031_v40 }
 0x1b1   : > { %v2038_v49 = vadd.f32 %v2037_v47, %v2035_v41  ;;  %v2058_v52 = vsel %vm2036_vm10, %v2051_v45, 0.0  ;;  %p2828_p2 = por %p2827_p1, %p2826_p0 }
 0x1b2   : > { %2044 = vadd.xlane.f32.xlu0 %v2043_v46  ;;  %v2053_v51 = vsel %vm2036_vm10, %v2048_v48, 0.0  ;;  %v2059_v55 = vadd.f32 %v2058_v52, %v2057_v54 }
 0x1b3   : > { %2039 = vadd.xlane.f32.xlu1 %v2038_v49  ;;  %v2054_v53 = vadd.f32 %v2053_v51, %v2052_v50  ;;  %p2829_p3 = pnand %p2828_p2, %p2822_p13 }
 0x1b6   : > { %2055 = vadd.xlane.f32.xlu0 %v2054_v53 }
 0x1b7   : > { %2060 = vadd.xlane.f32.xlu1 %v2059_v55 }
 0x1c8   : > { %2269 = vperm.xlu1 %2789, %v2265_v56  }
 0x1cc   : > { %2274 = vperm.xlu0 %2788, %v2266_v58   ;;  %2287 = vperm.xlu1 %2789, %v2283_v59  }
 0x1d0   : > { %2292 = vperm.xlu0 %2788, %v2284_v60  }
 0x23f   : > { %v2045_v61 = vpop.xlane.xlu0 %2044 }
 0x240   : > { %v2040_v62 = vpop.xlane.xlu1 %2039 }
 0x241   : > { %v2672_v63 = vpack.c.bf16 %v2045_v61, %v2040_v62 }
 0x243   : > { %v2056_v1 = vpop.xlane.xlu0 %2055  ;;  %2673 = vmatprep.subr.bf16.mxu1 %v2672_v63 }
 0x244   : > { %2675 = vmatpush3.bf16.msra.mxu1 %v2672_v63  ;;  %v2061_v2 = vpop.xlane.xlu1 %2060 }
 0x245   : > { %v2676_v4 = vpack.c.bf16 %v2061_v2, %v2056_v1 }
 0x247   : > { %2663 = vmatmul.mubr.msk.f32.vlgmr.msra.gmra.mrb[6].mxu1 %vm2064_vm11, %v2063_v3  ;;  %2677 = vmatprep.subr.bf16.mxu1 %v2676_v4 }
 0x248   : > { %2679 = vmatpush3.bf16.msra.mxu1 %v2676_v4  ;;  %2669 = vmatprep.mubr.msk.f32.mxu1 %vm2064_vm11, %v2062_v57  ;;  %v2270_v30 = vpop.permute.xlu1 %2269 }
 0x24b   : > { %2670 = vmatmul.mubr.msk.f32.vlgmr.msra.gmra.mrb[8].mxu1 %vm2064_vm11, %v2063_v3  ;;  %v2275_v31 = vpop.permute.xlu0 %2274 }
 0x24c   : > { %v2288_v32 = vpop.permute.xlu1 %2287 }
 0x24f   : > { %v2293_v34 = vpop.permute.xlu0 %2292 }
 0x31a   : > { %v2664_v5 = vpop.f32.mrb[6].mxu1 }
 0x31b   : > { %v2147_v6 = vmul.f32 0.001953125, %v2664_v5  ;;  %v2137_v0 = vpop.f32.mrb[7].mxu1 }
 0x31c   : > { %v2146_v7 = vmul.f32 0.001953125, %v2137_v0 }
 0x31d   : > { %2236 = vperm.xlu1 %2789, %v2147_v6   ;;  %v2226_v9 = vmul.f32 %v2147_v6, %v2147_v6 }
 0x31e   : > { %2231 = vperm.xlu0 %2788, %v2146_v7   ;;  %v2671_v8 = vpop.f32.mrb[8].mxu1  ;;  %v2225_v13 = vmul.f32 %v2146_v7, %v2146_v7 }
 0x31f   : > { %v2224_v10 = vmul.f32 0.001953125, %v2671_v8  ;;  %v2214_v11 = vpop.f32.mrb[9].mxu1 }
 0x320   : > { %v2223_v15 = vmul.f32 0.001953125, %v2214_v11 }
 0x321   : > { %v2228_v16 = vsub.f32 %v2224_v10, %v2226_v9 }
 0x322   : > { %v2227_v17 = vsub.f32 %v2223_v15, %v2225_v13 }
 0x323   : > { %v2246_v18 = vadd.f32 1e-05, %v2228_v16 }
 0x324   : > { %v2245_v19 = vadd.f32 1e-05, %v2227_v17 }
 0x325   : > { %2791 = vrsqrt.f32 %v2246_v18 }
 0x326   : > { %2793 = vrsqrt.f32 %v2245_v19 }
 0x32f   : > { %v2792_v24 = vpop.eup %2791 }
 0x330   : > { %v2794_v25 = vpop.eup %2793  ;;  %2256 = vperm.xlu0 %2788, %v2792_v24  }
 0x331   : > { %2251 = vperm.xlu1 %2789, %v2794_v25  }
 0x334   : > { %2312 = vperm.xlu0 %2788, %v2304_v26  }
 0x335   : > { %2307 = vperm.xlu1 %2789, %v2303_v27  }
 0x338   : > { %2330 = vperm.xlu0 %2788, %v2322_v28  }
 0x339   : > { %2325 = vperm.xlu1 %2789, %v2321_v29  }
 0x39c   : > { %v2237_v36 = vpop.permute.xlu1 %2236 }
 0x39d   : > { %v2232_v37 = vpop.permute.xlu0 %2231  ;;  %v2242_v38 = vsub.f32 %v3165_v21, %v2237_v36  ;;  %v2243_v39 = vsub.f32 %v3167_v23, %v2237_v36  ;;  %v2244_v40 = vsub.f32 %v3173_v33, %v2237_v36 }
 0x39e   : > { %v2239_v41 = vsub.f32 %v3158_v12, %v2232_v37  ;;  %v2240_v42 = vsub.f32 %v3160_v14, %v2232_v37  ;;  %v2241_v43 = vsub.f32 %v3175_v35, %v2232_v37 }
 0x3af   : > { %v2257_v44 = vpop.permute.xlu0 %2256 }
 0x3b0   : > { %v2262_v45 = vmul.f32 %v2257_v44, %v2242_v38  ;;  %v2263_v46 = vmul.f32 %v2257_v44, %v2243_v39  ;;  %v2264_v47 = vmul.f32 %v2257_v44, %v2244_v40  ;;  %v2252_v48 = vpop.permute.xlu1 %2251 }
 0x3b1   : > { %v2259_v49 = vmul.f32 %v2252_v48, %v2239_v41  ;;  %v2260_v50 = vmul.f32 %v2252_v48, %v2240_v42  ;;  %v2261_v51 = vmul.f32 %v2252_v48, %v2241_v43 }
 0x3b2   : > { %v2280_v52 = vmul.f32 %v2275_v31, %v2262_v45  ;;  %v2281_v21 = vmul.f32 %v2275_v31, %v2263_v46  ;;  %v2282_v53 = vmul.f32 %v2275_v31, %v2264_v47 }
 0x3b3   : > { %v2277_v23 = vmul.f32 %v2270_v30, %v2259_v49  ;;  %v2278_v54 = vmul.f32 %v2270_v30, %v2260_v50  ;;  %v2279_v33 = vmul.f32 %v2270_v30, %v2261_v51  ;;  %v2313_v55 = vpop.permute.xlu0 %2312 }
 0x3b4   : > { %v2298_v12 = vadd.f32 %v2293_v34, %v2280_v52  ;;  %v2299_v56 = vadd.f32 %v2293_v34, %v2281_v21  ;;  %v2300_v14 = vadd.f32 %v2293_v34, %v2282_v53  ;;  %v2308_v57 = vpop.permute.xlu1 %2307 }
 0x3b5   : > { %v2295_v35 = vadd.f32 %v2288_v32, %v2277_v23  ;;  %v2296_v58 = vadd.f32 %v2288_v32, %v2278_v54  ;;  %v2297_v59 = vadd.f32 %v2288_v32, %v2279_v33 }
 0x3b6   : > { %v2318_v60 = vmul.f32 %v2313_v55, %v2298_v12  ;;  %v2319_v61 = vmul.f32 %v2313_v55, %v2299_v56  ;;  %v2320_v62 = vmul.f32 %v2313_v55, %v2300_v14 }
 0x3b7   : > { %v2315_v63 = vmul.f32 %v2308_v57, %v2295_v35  ;;  %v2316_v1 = vmul.f32 %v2308_v57, %v2296_v58  ;;  %v2317_v2 = vmul.f32 %v2308_v57, %v2297_v59  ;;  %v2331_v3 = vpop.permute.xlu0 %2330 }
 0x3b8   : > { %v2336_v4 = vadd.f32 %v2331_v3, %v2318_v60  ;;  %v2337_v5 = vadd.f32 %v2331_v3, %v2319_v61  ;;  %v2338_v6 = vadd.f32 %v2331_v3, %v2320_v62  ;;  %v2326_v0 = vpop.permute.xlu1 %2325 }
 0x3b9   : > { %v2333_v7 = vadd.f32 %v2326_v0, %v2315_v63  ;;  %v2334_v8 = vadd.f32 %v2326_v0, %v2316_v1  ;;  %v2335_v9 = vadd.f32 %v2326_v0, %v2317_v2 }
 0x3ba   : > { %v2342_v10 = vsub.f32 0.0, %v2336_v4  ;;  %v2343_v11 = vsub.f32 0.0, %v2337_v5  ;;  %v2344_v13 = vsub.f32 0.0, %v2338_v6 }
 0x3bb   : > { %v2339_v15 = vsub.f32 0.0, %v2333_v7  ;;  %v2340_v16 = vsub.f32 0.0, %v2334_v8  ;;  %v2341_v17 = vsub.f32 0.0, %v2335_v9 }
 0x3bc   : > { %v2351_v18 = vmul.f32 1.442695, %v2342_v10  ;;  %v2353_v19 = vmul.f32 1.442695, %v2343_v11  ;;  %v2355_v20 = vmul.f32 1.442695, %v2344_v13 }
 0x3bd   : > { %v2345_v22 = vmul.f32 1.442695, %v2339_v15  ;;  %v2347_v24 = vmul.f32 1.442695, %v2340_v16  ;;  %v2349_v25 = vmul.f32 1.442695, %v2341_v17 }
 0x3be   : > { %2795 = vpow2.f32 %v2351_v18 }
 0x3bf   : > { %2797 = vpow2.f32 %v2353_v19 }
 0x3c0   : > { %2799 = vpow2.f32 %v2355_v20 }
 0x3c1   : > { %2801 = vpow2.f32 %v2345_v22 }
 0x3c2   : > { %2803 = vpow2.f32 %v2347_v24 }
 0x3c3   : > { %2805 = vpow2.f32 %v2349_v25 }
 0x3c8   : > { %v2796_v26 = vpop.eup %2795 }
 0x3c9   : > { %v2798_v27 = vpop.eup %2797  ;;  %v2360_v28 = vadd.f32 1.0, %v2796_v26 }
 0x3ca   : > { %v2800_v29 = vpop.eup %2799  ;;  %v2361_v30 = vadd.f32 1.0, %v2798_v27 }
 0x3cb   : > { %v2802_v31 = vpop.eup %2801  ;;  %v2362_v32 = vadd.f32 1.0, %v2800_v29  ;;  %2807 = vrcp.f32 %v2360_v28 }
 0x3cc   : > { %v2804_v34 = vpop.eup %2803  ;;  %2809 = vrcp.f32 %v2361_v30  ;;  %v2357_v36 = vadd.f32 1.0, %v2802_v31 }
 0x3cd   : > { %v2806_v37 = vpop.eup %2805  ;;  %2811 = vrcp.f32 %v2362_v32  ;;  %v2358_v38 = vadd.f32 1.0, %v2804_v34 }
 0x3ce   : > { %v2359_v39 = vadd.f32 1.0, %v2806_v37  ;;  %2813 = vrcp.f32 %v2357_v36 }
 0x3cf   : > { %2815 = vrcp.f32 %v2358_v38 }
 0x3d0   : > { %2817 = vrcp.f32 %v2359_v39 }
 0x3d5   : > { %v2808_v40 = vpop.eup %2807 }
 0x3d6   : > { %v2810_v41 = vpop.eup %2809  ;;  %v2372_v42 = vmul.f32 %v2808_v40, %v2336_v4 }
 0x3d7   : > { %v2812_v43 = vpop.eup %2811  ;;  %v2373_v44 = vmul.f32 %v2810_v41, %v2337_v5 }
 0x3d8   : > { %v2814_v45 = vpop.eup %2813  ;;  %v2374_v46 = vmul.f32 %v2812_v43, %v2338_v6  ;;  %2378 = vst [vmem:[%s355_s16 + $0x18] sm:$0xff] %v2372_v42 }
 0x3d9   : > { %v2816_v47 = vpop.eup %2815  ;;  %2379 = vst [vmem:[%s355_s16 + $0x20] sm:$0xff] %v2373_v44  ;;  %v2369_v48 = vmul.f32 %v2814_v45, %v2333_v7 }
 0x3da   : > { %v2818_v49 = vpop.eup %2817  ;;  %2380 = vst.msk [vmem:[%s355_s16 + $0x28] sm:$0xff] %vm2036_vm10, %v2374_v46  ;;  %v2370_v50 = vmul.f32 %v2816_v47, %v2334_v8 }
 0x3db   : > { %v2371_v51 = vmul.f32 %v2818_v49, %v2335_v9  ;;  %2375 = vst [vmem:[%s355_s16] sm:$0xff] %v2369_v48 }
 0x3dc   : > { %2376 = vst [vmem:[%s355_s16 + $0x8] sm:$0xff] %v2370_v50 }
 0x3dd   : > { %2377 = vst.msk [vmem:[%s355_s16 + $0x10] sm:$0xff] %vm2036_vm10, %v2371_v51 }
 0x3de   : > { %2832 = shalt.err (!%p2829_p3)
}
 0x3df   : > { %s2833_s21 = scalar_lea.hbm %s3232_s13, 768  ;;  %s2837_s16 = scalar_lea.hbm %s3289_s9, 1536 }
 0x3e0   : > { %p2834_p4 = scmp.ne.s32.totalorder %s3232_s13, %s2833_s21  ;;  %p2838_p9 = scmp.lt.u32.totalorder %s3232_s13, %s3289_s9 }
 0x3e1   : > { %p2839_p10 = scmp.lt.u32.totalorder %s2837_s16, %s2833_s21  ;;  %p2841_p12 = scmp.lt.u32.totalorder %s2833_s21, %s3232_s13 }
 0x3e2   : > { %p2835_p7 = pnand %p2834_p4, %p2984_p5 }
 0x3e3   : > { %p2840_p11 = por %p2839_p10, %p2838_p9 }
 0x3e4   : > { %p2836_p8 = pneg %p2835_p7 }
 0x3e5   : > { %p2842_p13 = por %p2841_p12, %p2840_p11 }
 0x3e7   : > { %p2843_p0 = pnand %p2842_p13, %p2836_p8 }
 0x3e9   : > { %2846 = shalt.err (!%p2843_p0)
}
 0x3ea   : > { %s2894_s25 = smov 384   ;;  %s2895_s26 = smov 24  }
 0x3eb   : > { %2737 = dma.vmem_to_hbm [thread:$0]  (%p2984_p5), %s3234_s17, 768, %s3232_s13, %s3239_s24, %s2894_s25, %s2894_s25, %s2895_s26  }
 0x3ec PF: > { %p2743_p1 = scmp.ge.s32.totalorder %s2881_s12, 2  ;;  %s2410_s27 = sand.u32 1, %s2869_s30  }
 0x3ed   : > { %s2411_s28 = scalar_lea.sflag [#allocation3], %s2410_s27 }
 0x3ee   : > { %p2740_p2 = pnand %p2743_p1, %p2988_p6 }
 0x3f0   : > { %2864 = dma.done.wait (!%p2740_p2), %s2411_s28, 768  }
 0x3f1   : > { %2866 = vsyncadd (!%p2740_p2), %s2411_s28, 4294966528  ;;  %p19_p3 = scmp.ge.s32.totalorder %s2971_s15, 4   ;;  %s3292_s30 = smov %s2873_s10 }
 0x3f2   : > { %s3293_s10 = smov %s2877_s11  ;;  %s3294_s11 = smov %s2982_s18 }
 0x3f3   : > { %s3295_s12 = smov %s2971_s15  ;;  %21 = sbr.rel (!%p19_p3) target bundleno = 3 (0x3), region = 105 }
 0x3fa   :  { %2416 = vsyncpa [#allocation3], 1 }
 0x3fb   :  { %2418 = vsyncpa [#allocation3 + $0x1], 1 }

</bundles_post_ra>
